<compile_context>
chip_gen: v6e
topology: v6e:2x2x1
jax: 0.10.0
libtpu: 0.0.40
codegen_flags: <defaults>
</compile_context>

<pallas_src>
import jax
import jax.numpy as jnp
from jax import lax
from jax.experimental import pallas as pl
from jax.experimental.pallas import tpu as pltpu

EPS = 1e-5
LANE = 128
SUBLANE = 8


def _round_up(n, m):
    return ((n + m - 1) // m) * m


# ----------------------------------------------------------------------------------
# Kernel: three matmuls + bias adds.  All BN math was folded into the weights.
# x_ref: (TB, D_in) bf16 | w1: (D_in, LP) bf16 | w2, w3: (LP, LP) bf16
# bias_ref: (3, LP) f32  (rows: b1', b2', b3 padded) | o_ref: (TB, LP) f32
# ----------------------------------------------------------------------------------
def _fused_mlp_kernel(x_ref, w1_ref, w2_ref, w3_ref, bias_ref, o_ref):
    # Linear1 (+ folded BatchNorm1).  f32 accumulation on the MXU.
    h = jnp.dot(x_ref[...], w1_ref[...], preferred_element_type=jnp.float32)
    h = h + bias_ref[0:1, :]                       # f32 bias add (VPU)
    # Dropout(p=0.5): identity in eval mode.

    # Linear2 (+ folded BatchNorm2).
    h = jnp.dot(h.astype(w2_ref.dtype), w2_ref[...],
                preferred_element_type=jnp.float32)
    h = h + bias_ref[1:2, :]
    # Dropout(p=0.5): identity in eval mode.

    # Linear3 (output head, zero-padded to lane-dense width).
    h = jnp.dot(h.astype(w3_ref.dtype), w3_ref[...],
                preferred_element_type=jnp.float32)
    o_ref[...] = (h + bias_ref[2:3, :]).astype(o_ref.dtype)


# ----------------------------------------------------------------------------------
# Trace-time preprocessing: fold BN into Linear, zero-pad to lane-dense widths,
# stack biases into a single operand, cast weights to the compute dtype.
# ----------------------------------------------------------------------------------
def _fold_and_pad(params, d_in, hidden, d_out, compute_dtype=jnp.bfloat16):
    lp = _round_up(max(hidden, d_out, LANE), LANE)   # lane-dense feature width

    s1 = params["g1"] * lax.rsqrt(params["v1"] + EPS)          # (1, H)
    s2 = params["g2"] * lax.rsqrt(params["v2"] + EPS)
    w1f = params["w1"] * s1                                     # column-scale
    b1f = (params["b1"] - params["m1"]) * s1 + params["be1"]
    w2f = params["w2"] * s2
    b2f = (params["b2"] - params["m2"]) * s2 + params["be2"]

    w1p = jnp.zeros((d_in, lp), jnp.float32).at[:, :hidden].set(w1f)
    w2p = jnp.zeros((lp, lp), jnp.float32).at[:hidden, :hidden].set(w2f)
    w3p = jnp.zeros((lp, lp), jnp.float32).at[:hidden, :d_out].set(params["w3"])

    bias = jnp.zeros((3, lp), jnp.float32)
    bias = bias.at[0, :hidden].set(b1f[0])
    bias = bias.at[1, :hidden].set(b2f[0])
    bias = bias.at[2, :d_out].set(params["b3"][0])

    return (w1p.astype(compute_dtype), w2p.astype(compute_dtype),
            w3p.astype(compute_dtype), bias, lp)


def nn_model_2_forward(x, params, *, tb_target=512, compute_dtype=jnp.bfloat16):
    """Fused eval-mode forward. x: (B, D_in) float32. Returns (B, D_out) float32."""
    B, d_in = x.shape
    hidden = params["w1"].shape[1]
    d_out = params["w3"].shape[1]

    w1p, w2p, w3p, bias, lp = _fold_and_pad(params, d_in, hidden, d_out, compute_dtype)

    # Batch tiling: TB up to 512 rows (amortizes the ~0.35us per-step overhead);
    # pad B to a multiple of TB so every block is full (no partial blocks).
    tb = min(tb_target, _round_up(B, SUBLANE))
    b_pad = _round_up(B, tb)
    xc = x.astype(compute_dtype)
    if b_pad != B:
        xc = jnp.zeros((b_pad, d_in), compute_dtype).at[:B].set(xc)
    grid = (b_pad // tb,)

    flops = 2 * b_pad * (d_in * lp + lp * lp + lp * lp)
    bytes_accessed = (
        b_pad * d_in * xc.dtype.itemsize            # x read
        + (w1p.size + w2p.size + w3p.size) * w1p.dtype.itemsize
        + bias.size * 4
        + b_pad * lp * 4                            # output write
    )

    out = pl.pallas_call(
        _fused_mlp_kernel,
        out_shape=jax.ShapeDtypeStruct((b_pad, lp), jnp.float32),
        grid=grid,
        in_specs=[
            pl.BlockSpec((tb, d_in), lambda i: (i, 0)),   # x: tiled along batch
            pl.BlockSpec((d_in, lp), lambda i: (0, 0)),   # W1': resident in VMEM
            pl.BlockSpec((lp, lp), lambda i: (0, 0)),     # W2': resident
            pl.BlockSpec((lp, lp), lambda i: (0, 0)),     # W3 : resident
            pl.BlockSpec((3, lp), lambda i: (0, 0)),      # stacked biases (f32)
        ],
        out_specs=pl.BlockSpec((tb, lp), lambda i: (i, 0)),
        compiler_params=pltpu.CompilerParams(
            dimension_semantics=("parallel",),            # shard batch over TCs (v7x)
        ),
        cost_estimate=pl.CostEstimate(
            flops=flops, transcendentals=0, bytes_accessed=bytes_accessed),
    )(xc, w1p, w2p, w3p, bias)

    return out[:B, :d_out]


# ----------------------------------------------------------------------------------
# Parameters & references
# ----------------------------------------------------------------------------------
def make_params(key, d_in, hidden, d_out):
    """Deterministic synthetic parameters with PyTorch-equivalent shapes
    (Linear weights already transposed to (in, out))."""
    ks = jax.random.split(key, 8)
    p = {}
    p["w1"] = 0.1 * jax.random.normal(ks[0], (d_in, hidden), jnp.float32)
    p["b1"] = 0.05 * jax.random.normal(ks[1], (1, hidden), jnp.float32)
    p["w2"] = 0.1 * jax.random.normal(ks[2], (hidden, hidden), jnp.float32)
    p["b2"] = 0.05 * jax.random.normal(ks[3], (1, hidden), jnp.float32)
    p["w3"] = 0.1 * jax.random.normal(ks[4], (hidden, d_out), jnp.float32)
    p["b3"] = 0.05 * jax.random.normal(ks[5], (1, d_out), jnp.float32)
    # BatchNorm1d affine + running stats (non-trivial, deterministic)
    p["g1"] = 1.0 + 0.1 * jax.random.normal(ks[6], (1, hidden), jnp.float32)
    p["be1"] = 0.1 * jnp.ones((1, hidden), jnp.float32)
    p["m1"] = 0.02 * jnp.arange(hidden, dtype=jnp.float32).reshape(1, hidden)
    p["v1"] = 1.0 + 0.01 * jnp.arange(hidden, dtype=jnp.float32).reshape(1, hidden)
    p["g2"] = 1.0 + 0.1 * jax.random.normal(ks[7], (1, hidden), jnp.float32)
    p["be2"] = -0.1 * jnp.ones((1, hidden), jnp.float32)
    p["m2"] = -0.01 * jnp.arange(hidden, dtype=jnp.float32).reshape(1, hidden)
    p["v2"] = 1.5 * jnp.ones((1, hidden), jnp.float32)
    return p


def reference_forward_f32(x, p):
    """Original module semantics (Linear -> BN(eval) -> ... ) in full f32."""
    h = x @ p["w1"] + p["b1"]
    h = (h - p["m1"]) * lax.rsqrt(p["v1"] + EPS) * p["g1"] + p["be1"]
    h = h @ p["w2"] + p["b2"]
    h = (h - p["m2"]) * lax.rsqrt(p["v2"] + EPS) * p["g2"] + p["be2"]
    return h @ p["w3"] + p["b3"]


def reference_forward_folded(x, params, compute_dtype=jnp.bfloat16):
    """Plain-JAX mirror of the exact arithmetic the kernel performs."""
    B, d_in = x.shape
    hidden = params["w1"].shape[1]
    d_out = params["w3"].shape[1]
    w1p, w2p, w3p, bias, _ = _fold_and_pad(params, d_in, hidden, d_out, compute_dtype)
    xc = x.astype(compute_dtype)
    h = jnp.dot(xc, w1p, preferred_element_type=jnp.float32) + bias[0:1]
    h = jnp.dot(h.astype(compute_dtype), w2p, preferred_element_type=jnp.float32) + bias[1:2]
    h = jnp.dot(h.astype(compute_dtype), w3p, preferred_element_type=jnp.float32) + bias[2:3]
    return h[:, :d_out]


if __name__ == "__main__":
    B, D_IN, HIDDEN, D_OUT = 8, 32, 32, 2

    key = jax.random.PRNGKey(0)
    kx, kp = jax.random.split(key)
    x = jax.random.normal(kx, (B, D_IN), jnp.float32)
    params = make_params(kp, D_IN, HIDDEN, D_OUT)

    out = nn_model_2_forward(x, params)
    out = jax.block_until_ready(out)
    assert out.shape == (B, D_OUT)

    # Tight check vs. a JAX mirror of the kernel's bf16/f32 arithmetic.
    ref_mirror = reference_forward_folded(x, params)
    assert jnp.allclose(out, ref_mirror, atol=2e-3, rtol=2e-3), \
        "Pallas output mismatch vs bf16-folded reference"

    # Semantic check vs. the original f32 Linear/BN(eval)/Dropout(eval) forward
    # (looser tolerance accounts only for bf16 quantization of x / weights).
    ref_f32 = reference_forward_f32(x, params)
    assert jnp.allclose(out, ref_f32, atol=5e-2, rtol=5e-2), \
        "Pallas output mismatch vs f32 module-semantics reference"

    print("KERNEL_OK")
</pallas_src>

<mosaic_0001>
module attributes {stable_mosaic.version = 11 : i64} {
  func.func @_fused_mlp_kernel(%arg0: i32, %arg1: memref<8x32xbf16, #tpu.memory_space<vmem>>, %arg2: memref<32x128xbf16, #tpu.memory_space<vmem>>, %arg3: memref<128x128xbf16, #tpu.memory_space<vmem>>, %arg4: memref<128x128xbf16, #tpu.memory_space<vmem>>, %arg5: memref<3x128xf32, #tpu.memory_space<vmem>>, %arg6: memref<8x128xf32, #tpu.memory_space<vmem>>) attributes {dimension_semantics = [#tpu.dimension_semantics<parallel>], iteration_bounds = array<i64: 1>, scalar_prefetch = 0 : i64, scratch_operands = 0 : i64, tpu.core_type = #tpu.core_type<tc>, window_params = [{transform_indices = @transform_0, window_bounds = array<i64: 8, 32>}, {pipeline_mode = #tpu.pipeline_mode<synchronous>, transform_indices = @transform_1, window_bounds = array<i64: 32, 128>}, {pipeline_mode = #tpu.pipeline_mode<synchronous>, transform_indices = @transform_2, window_bounds = array<i64: 128, 128>}, {pipeline_mode = #tpu.pipeline_mode<synchronous>, transform_indices = @transform_3, window_bounds = array<i64: 128, 128>}, {pipeline_mode = #tpu.pipeline_mode<synchronous>, transform_indices = @transform_4, window_bounds = array<i64: 3, 128>}, {transform_indices = @transform_5, window_bounds = array<i64: 8, 128>}]} {
    %c0 = arith.constant 0 : index
    %c0_0 = arith.constant 0 : index
    %0 = vector.load %arg1[%c0, %c0_0] : memref<8x32xbf16, #tpu.memory_space<vmem>>, vector<8x32xbf16>
    %c0_1 = arith.constant 0 : index
    %c0_2 = arith.constant 0 : index
    %1 = vector.load %arg2[%c0_1, %c0_2] : memref<32x128xbf16, #tpu.memory_space<vmem>>, vector<32x128xbf16>
    %cst = arith.constant dense<0.000000e+00> : vector<8x128xf32>
    %2 = tpu.matmul %0, %1, %cst {dimension_numbers = #tpu.dot_dimension_numbers<[1], [0], [0], [1], [0, 0, 1, 1], [], []>} : vector<8x32xbf16>, vector<32x128xbf16>, vector<8x128xf32> -> vector<8x128xf32>
    %c0_3 = arith.constant 0 : index
    %c0_4 = arith.constant 0 : index
    %3 = vector.load %arg5[%c0_3, %c0_4] : memref<3x128xf32, #tpu.memory_space<vmem>>, vector<1x128xf32>
    %4 = vector.broadcast %3 : vector<1x128xf32> to vector<8x128xf32>
    %5 = arith.addf %2, %4 : vector<8x128xf32>
    %6 = arith.truncf %5 : vector<8x128xf32> to vector<8x128xbf16>
    %c0_5 = arith.constant 0 : index
    %c0_6 = arith.constant 0 : index
    %7 = vector.load %arg3[%c0_5, %c0_6] : memref<128x128xbf16, #tpu.memory_space<vmem>>, vector<128x128xbf16>
    %cst_7 = arith.constant dense<0.000000e+00> : vector<8x128xf32>
    %8 = tpu.matmul %6, %7, %cst_7 {dimension_numbers = #tpu.dot_dimension_numbers<[1], [0], [0], [1], [0, 0, 1, 1], [], []>} : vector<8x128xbf16>, vector<128x128xbf16>, vector<8x128xf32> -> vector<8x128xf32>
    %c1 = arith.constant 1 : index
    %c0_8 = arith.constant 0 : index
    %9 = vector.load %arg5[%c1, %c0_8] : memref<3x128xf32, #tpu.memory_space<vmem>>, vector<1x128xf32>
    %10 = vector.broadcast %9 : vector<1x128xf32> to vector<8x128xf32>
    %11 = arith.addf %8, %10 : vector<8x128xf32>
    %12 = arith.truncf %11 : vector<8x128xf32> to vector<8x128xbf16>
    %c0_9 = arith.constant 0 : index
    %c0_10 = arith.constant 0 : index
    %13 = vector.load %arg4[%c0_9, %c0_10] : memref<128x128xbf16, #tpu.memory_space<vmem>>, vector<128x128xbf16>
    %cst_11 = arith.constant dense<0.000000e+00> : vector<8x128xf32>
    %14 = tpu.matmul %12, %13, %cst_11 {dimension_numbers = #tpu.dot_dimension_numbers<[1], [0], [0], [1], [0, 0, 1, 1], [], []>} : vector<8x128xbf16>, vector<128x128xbf16>, vector<8x128xf32> -> vector<8x128xf32>
    %c2 = arith.constant 2 : index
    %c0_12 = arith.constant 0 : index
    %15 = vector.load %arg5[%c2, %c0_12] : memref<3x128xf32, #tpu.memory_space<vmem>>, vector<1x128xf32>
    %16 = vector.broadcast %15 : vector<1x128xf32> to vector<8x128xf32>
    %17 = arith.addf %14, %16 : vector<8x128xf32>
    %c0_13 = arith.constant 0 : index
    %c0_14 = arith.constant 0 : index
    %18 = vector.load %arg6[%c0_13, %c0_14] : memref<8x128xf32, #tpu.memory_space<vmem>>, vector<8x128xf32>
    tpu.vector_store %arg6[%c0_13, %c0_14], %17 {strides = array<i32>} : memref<8x128xf32, #tpu.memory_space<vmem>>, vector<8x128xf32>,
    return
  }
  func.func @transform_0(%arg0: i32) -> (i32, i32) {
    %c0_i32 = arith.constant 0 : i32
    %c0_i32_0 = arith.constant 0 : i32
    return %arg0, %c0_i32 : i32, i32
  }
  func.func @transform_1(%arg0: i32) -> (i32, i32) {
    %c0_i32 = arith.constant 0 : i32
    %c0_i32_0 = arith.constant 0 : i32
    %c0_i32_1 = arith.constant 0 : i32
    return %c0_i32, %c0_i32_0 : i32, i32
  }
  func.func @transform_2(%arg0: i32) -> (i32, i32) {
    %c0_i32 = arith.constant 0 : i32
    %c0_i32_0 = arith.constant 0 : i32
    %c0_i32_1 = arith.constant 0 : i32
    return %c0_i32, %c0_i32_0 : i32, i32
  }
  func.func @transform_3(%arg0: i32) -> (i32, i32) {
    %c0_i32 = arith.constant 0 : i32
    %c0_i32_0 = arith.constant 0 : i32
    %c0_i32_1 = arith.constant 0 : i32
    return %c0_i32, %c0_i32_0 : i32, i32
  }
  func.func @transform_4(%arg0: i32) -> (i32, i32) {
    %c0_i32 = arith.constant 0 : i32
    %c0_i32_0 = arith.constant 0 : i32
    %c0_i32_1 = arith.constant 0 : i32
    return %c0_i32, %c0_i32_0 : i32, i32
  }
  func.func @transform_5(%arg0: i32) -> (i32, i32) {
    %c0_i32 = arith.constant 0 : i32
    %c0_i32_0 = arith.constant 0 : i32
    return %arg0, %c0_i32 : i32, i32
  }
}

</mosaic_0001>

<bundles_post_ra>
// kernel: tpu_custom_call.1
= control target key start
LH: loop header
LB: loop body
LE: loop exit
PB: predicated region body
PF: predicated region fallthrough
CT: control target
= control target key end

     0   :  { %10 = vsyncpa [#allocation3], 0  ;;  %s680_s0 = inlined_call_operand.hbm [shape: bf16[8,32], index: 0, kind: input, shape index: {}]   ;;  %s681_s1 = inlined_call_operand.hbm [shape: bf16[32,128], index: 1, kind: input, shape index: {}]   ;;  %s682_s2 = inlined_call_operand.hbm [shape: bf16[128,128], index: 2, kind: input, shape index: {}]   ;;  %s683_s3 = inlined_call_operand.hbm [shape: bf16[128,128], index: 3, kind: input, shape index: {}]   ;;  %s684_s4 = inlined_call_operand.vmem [shape: f32[3,128], index: 4, kind: input, shape index: {}]   ;;  %s685_s5 = inlined_call_operand.hbm [shape: f32[8,128], index: 5, kind: output, shape index: {}]  }
   0x1   :  { %11 = vsyncpa [#allocation6], 0 }
   0x2   :  { %12 = vsyncpa [#allocation9], 0 }
   0x3   :  { %13 = vsyncpa [#allocation4], 0  ;;  %s605_s18 = smov [#allocation5]  }
   0x4   :  { %s29_s19 = sshll.u32 %s605_s18, 4  ;;  %s30_s19 = int_to_ptr.vmem [resolvable:$true] %s29_s19 }
   0x5   :  { %s505_s20 = scalar_lea.vmem %s30_s19, 256  ;;  %p510_p1 = scmp.lt.s32.totalorder %s30_s19, %s30_s19 }
   0x6   :  { %p506_p0 = scmp.ne.s32.totalorder %s30_s19, %s505_s20  ;;  %p511_p2 = scmp.lt.s32.totalorder %s505_s20, %s505_s20 }
   0x8   :  { %p512_p3 = por %p511_p2, %p510_p1 }
   0xa   :  { %p513_p4 = pnand %p512_p3, %p506_p0 }
   0xc   :  { %516 = shalt.err (!%p513_p4)
}
   0xd   :  { %s606_s21 = smov 64   ;;  %s607_s22 = smov 4  }
   0xe   :  { %35 = dma.hbm_to_vmem [thread:$0]  %s681_s1, 256, %s30_s19, [#allocation6], %s606_s21, %s606_s21, %s607_s22  }
   0xf   :  { %s608_s25 = smov [#allocation2]   ;;  %s609_s27 = smov [#allocation7]  }
  0x10   :  { %s20_s26 = sshll.u32 %s608_s25, 4  ;;  %s41_s28 = sshll.u32 %s609_s27, 4  ;;  %s21_s26 = int_to_ptr.vmem [resolvable:$true] %s20_s26  ;;  %s42_s28 = int_to_ptr.vmem [resolvable:$true] %s41_s28 }
  0x11   :  { %s525_s29 = scalar_lea.vmem %s21_s26, 64  ;;  %p530_p6 = scmp.lt.s32.totalorder %s21_s26, %s21_s26 }
  0x12   :  { %p526_p5 = scmp.ne.s32.totalorder %s21_s26, %s525_s29  ;;  %p531_p7 = scmp.lt.s32.totalorder %s525_s29, %s525_s29 }
  0x14   :  { %p532_p8 = por %p531_p7, %p530_p6 }
  0x16   :  { %p533_p9 = pnand %p532_p8, %p526_p5 }
  0x18   :  { %536 = shalt.err (!%p533_p9)
}
  0x19   :  { %23 = dma.hbm_to_vmem [thread:$0]  %s680_s0, 64, %s21_s26, [#allocation3]  }
  0x1a   :  { %s545_s7 = scalar_lea.vmem %s42_s28, 1024  ;;  %p550_p11 = scmp.lt.s32.totalorder %s42_s28, %s42_s28 }
  0x1b   :  { %p546_p10 = scmp.ne.s32.totalorder %s42_s28, %s545_s7  ;;  %p551_p12 = scmp.lt.s32.totalorder %s545_s7, %s545_s7 }
  0x1d   :  { %p552_p13 = por %p551_p12, %p550_p11 }
  0x1f   :  { %p553_p0 = pnand %p552_p13, %p546_p10 }
  0x21   :  { %556 = shalt.err (!%p553_p0)
}
  0x22   :  { %47 = dma.hbm_to_vmem [thread:$0]  %s682_s2, 1024, %s42_s28, [#allocation6], %s606_s21, %s606_s21, %s607_s22  }
  0x23   :  { %s610_s9 = smov [#allocation8]  }
  0x24   :  { %s53_s10 = sshll.u32 %s610_s9, 4  ;;  %s54_s10 = int_to_ptr.vmem [resolvable:$true] %s53_s10 }
  0x25   :  { %s565_s11 = scalar_lea.vmem %s54_s10, 1024  ;;  %p570_p2 = scmp.lt.s32.totalorder %s54_s10, %s54_s10 }
  0x26   :  { %p566_p1 = scmp.ne.s32.totalorder %s54_s10, %s565_s11  ;;  %p571_p3 = scmp.lt.s32.totalorder %s565_s11, %s565_s11 }
  0x28   :  { %p572_p4 = por %p571_p3, %p570_p2 }
  0x2a   :  { %p573_p5 = pnand %p572_p4, %p566_p1 }
  0x2c   :  { %576 = shalt.err (!%p573_p5)
}
  0x2d   :  { %59 = dma.hbm_to_vmem [thread:$0]  %s683_s3, 1024, %s54_s10, [#allocation9], %s606_s21, %s606_s21, %s607_s22  }
  0x2e   :  { %597 = dma.done.wait [#allocation3], 64  }
  0x2f   :  { %598 = vsyncadd [#allocation3], 4294967232 }
  0x30   :  { %599 = dma.done.wait [#allocation6], 1280  }
  0x31   :  { %600 = vsyncadd [#allocation6], 4294966016 }
  0x32   :  { %601 = dma.done.wait [#allocation9], 1024  }
  0x33   :  { %602 = vsyncadd [#allocation9], 4294966272  ;;  %v611_v0 = vmov 0.0   ;;  %vm612_vm0 = vmmov 0   ;;  %v479_v1 = vld [vmem:[#allocation5 + $0x8] sm:$0xff]   ;;  %v480_v2 = vld [vmem:[#allocation5] sm:$0xff]  }
  0x34   :  { %422 = vmatprep.subr.bf16.mxu0 %v611_v0  ;;  %426 = vmatprep.mubr.msk.bf16.mxu0 %vm612_vm0, %v611_v0  ;;  %v481_v3 = vld [vmem:[#allocation7 + $0x38] sm:$0xff]   ;;  %vm97_vm1 = vcmask 261120   ;;  %v482_v4 = vld [vmem:[#allocation7 + $0x30] sm:$0xff]   ;;  %v75_v5 = vld [vmem:[#allocation2] sm:$0xf]  ;;  %s613_s17 = smov [#allocation10]  }
  0x35   :  { %430 = vmatprep.subr.bf16.mxu1 %v611_v0  ;;  %446 = vmatprep.mubr.msk.bf16.mxu1 %vm612_vm0, %v611_v0  ;;  %v483_v6 = vld [vmem:[#allocation7 + $0x28] sm:$0xff]   ;;  %v484_v7 = vld [vmem:[#allocation7 + $0x20] sm:$0xff]   ;;  %v485_v8 = vld [vmem:[#allocation7 + $0x18] sm:$0xff]   ;;  %s368_s18 = sshll.u32 %s613_s17, 4  ;;  %s369_s18 = int_to_ptr.vmem [resolvable:$true] %s368_s18 }
  0x36   :  { %423 = vmatpush3.bf16.msra.mxu0 %v479_v1  ;;  %431 = vmatpush3.bf16.msra.mxu1 %v481_v3  ;;  %v486_v9 = vld [vmem:[#allocation7 + $0x10] sm:$0xff]   ;;  %v487_v10 = vld [vmem:[#allocation7 + $0x8] sm:$0xff]   ;;  %v488_v11 = vld [vmem:[#allocation7] sm:$0xff]   ;;  %s577_s19 = scalar_lea.vmem %s369_s18, 128  ;;  %p582_p7 = scmp.lt.s32.totalorder %s369_s18, %s369_s18 }
  0x37   :  { %424 = vmatprep.subr.bf16.mxu0 %v611_v0  ;;  %432 = vmatprep.subr.bf16.mxu1 %v611_v0  ;;  %v489_v12 = vld [vmem:[#allocation8 + $0x38] sm:$0xff]   ;;  %v490_v13 = vld [vmem:[#allocation8 + $0x30] sm:$0xff]   ;;  %v491_v14 = vld [vmem:[#allocation8 + $0x28] sm:$0xff]   ;;  %p578_p6 = scmp.ne.s32.totalorder %s369_s18, %s577_s19  ;;  %p583_p8 = scmp.lt.s32.totalorder %s577_s19, %s577_s19 }
  0x38   :  { %v492_v15 = vld [vmem:[#allocation8 + $0x20] sm:$0xff]   ;;  %v493_v16 = vld [vmem:[#allocation8 + $0x18] sm:$0xff]   ;;  %v494_v17 = vld [vmem:[#allocation8 + $0x10] sm:$0xff]  }
  0x39   :  { %v495_v18 = vld [vmem:[#allocation8 + $0x8] sm:$0xff]   ;;  %v496_v26 = vld [vmem:[#allocation8] sm:$0xff]   ;;  %p584_p9 = por %p583_p8, %p582_p7 }
  0x3a   :  { %425 = vmatpush3.bf16.msra.mxu0 %v480_v2  ;;  %433 = vmatpush3.bf16.msra.mxu1 %v482_v4  ;;  %v379_v19 = vld [vmem:[%s684_s4] ss:$0 sm:$0xff]  ;;  %v383_v27 = vld [vmem:[%s684_s4 + $0x1] ss:$0 sm:$0xff]  ;;  %v392_v34 = vld [vmem:[%s684_s4 + $0x2] ss:$0 sm:$0xff] }
  0x3b   :  { %450 = vmatprep.subr.bf16.mxu0 %v611_v0  ;;  %434 = vmatprep.subr.bf16.mxu1 %v611_v0  ;;  %p585_p10 = pnand %p584_p9, %p578_p6 }
  0x3d   :  { %427 = vmatmul.mubr.msk.bf16.vlgmr.msra.gmra.mxu0 %vm97_vm1, %v75_v5 }
  0x3e   :  { %466 = vmatprep.mubr.msk.bf16.mxu0 %vm612_vm0, %v611_v0  ;;  %435 = vmatpush3.bf16.msra.mxu1 %v483_v6 }
  0x3f   :  { %436 = vmatprep.subr.bf16.mxu1 %v611_v0  ;;  %451 = vmatpush3.bf16.msra.mxu0 %v489_v12 }
  0x40   :  { %452 = vmatprep.subr.bf16.mxu0 %v611_v0 }
  0x42   :  { %437 = vmatpush3.bf16.msra.mxu1 %v484_v7 }
  0x43   :  { %438 = vmatprep.subr.bf16.mxu1 %v611_v0  ;;  %453 = vmatpush3.bf16.msra.mxu0 %v490_v13 }
  0x44   :  { %454 = vmatprep.subr.bf16.mxu0 %v611_v0 }
  0x46   :  { %439 = vmatpush3.bf16.msra.mxu1 %v485_v8 }
  0x47   :  { %440 = vmatprep.subr.bf16.mxu1 %v611_v0  ;;  %455 = vmatpush3.bf16.msra.mxu0 %v491_v14 }
  0x48   :  { %456 = vmatprep.subr.bf16.mxu0 %v611_v0 }
  0x4a   :  { %441 = vmatpush3.bf16.msra.mxu1 %v486_v9 }
  0x4b   :  { %442 = vmatprep.subr.bf16.mxu1 %v611_v0  ;;  %457 = vmatpush3.bf16.msra.mxu0 %v492_v15 }
  0x4c   :  { %458 = vmatprep.subr.bf16.mxu0 %v611_v0 }
  0x4e   :  { %443 = vmatpush3.bf16.msra.mxu1 %v487_v10 }
  0x4f   :  { %444 = vmatprep.subr.bf16.mxu1 %v611_v0  ;;  %459 = vmatpush3.bf16.msra.mxu0 %v493_v16 }
  0x50   :  { %460 = vmatprep.subr.bf16.mxu0 %v611_v0 }
  0x52   :  { %445 = vmatpush3.bf16.msra.mxu1 %v488_v11 }
  0x53   :  { %461 = vmatpush3.bf16.msra.mxu0 %v494_v17 }
  0x54   :  { %462 = vmatprep.subr.bf16.mxu0 %v611_v0 }
  0x57   :  { %463 = vmatpush3.bf16.msra.mxu0 %v495_v18 }
  0x58   :  { %464 = vmatprep.subr.bf16.mxu0 %v611_v0 }
  0x5b   :  { %465 = vmatpush3.bf16.msra.mxu0 %v496_v26 }
  0xfd   :  { %v135_v20 = vpop.f32.mrf.mxu0 }
  0xfe   :  { %v136_v21 = vadd.f32 %v379_v19, %v135_v20 }
  0xff   :  { %v428_v22 = vpop.f32.mrf.mxu0 }
 0x100   :  { %v141_v23 = vpack.c.bf16 %v136_v21, %v136_v21 }
 0x101   :  { %v138_v24 = vpop.f32.mrf.mxu0 }
 0x102   :  { %447 = vmatmul.mubr.bf16.vlgmr.msra.gmra.mxu1 %v141_v23 }
 0x103   :  { %v429_v25 = vpop.f32.mrf.mxu0 }
 0x1c2   :  { %v245_v28 = vpop.f32.mrf.mxu1 }
 0x1c3   :  { %v246_v29 = vadd.f32 %v383_v27, %v245_v28 }
 0x1c4   :  { %v448_v30 = vpop.f32.mrf.mxu1 }
 0x1c5   :  { %v251_v31 = vpack.c.bf16 %v246_v29, %v246_v29 }
 0x1c6   :  { %v248_v32 = vpop.f32.mrf.mxu1 }
 0x1c7   :  { %467 = vmatmul.mubr.bf16.vlgmr.msra.gmra.mxu0 %v251_v31 }
 0x1c8   :  { %v449_v33 = vpop.f32.mrf.mxu1 }
 0x287   :  { %v355_v35 = vpop.f32.mrf.mxu0 }
 0x288   :  { %v356_v36 = vadd.f32 %v392_v34, %v355_v35 }
 0x289   :  { %v468_v37 = vpop.f32.mrf.mxu0 }
 0x28a   :  { %361 = vst [vmem:[#allocation10] sm:$0xff] %v356_v36 }
 0x28b   :  { %v358_v38 = vpop.f32.mrf.mxu0 }
 0x28c   :  { %588 = shalt.err (!%p585_p10)
}
 0x28d   :  { %371 = dma.vmem_to_hbm [thread:$0]  %s369_s18, 128, %s685_s5, [#allocation4]   ;;  %v469_v39 = vpop.f32.mrf.mxu0 }
 0x28e   :  { %603 = dma.done.wait [#allocation4], 128  }
 0x28f   :  { %604 = vsyncadd [#allocation4], 4294967168 }
 0x290   :  { %375 = vsyncpa [#allocation3], 1 }
 0x291   :  { %376 = vsyncpa [#allocation6], 1 }
 0x292   :  { %377 = vsyncpa [#allocation9], 1 }
 0x293   :  { %378 = vsyncpa [#allocation4], 1 }

</bundles_post_ra>
